<compile_context>
chip_gen: v6e
topology: v6e:2x2x1
jax: 0.10.0
libtpu: 0.0.40
codegen_flags: <defaults>
</compile_context>

<pallas_src>
import functools

import numpy as np
import jax
import jax.numpy as jnp
from jax.experimental import pallas as pl
from jax.experimental.pallas import tpu as pltpu


def _dwt_haar_kernel(x_ref, m_ref, o_ref, *, w, chunk):
    # x_ref: (1, tr, 2W)     row r holds [even input row | odd input row]
    # m_ref: (chunk, chunk)  column-pairing matrix, entries in {0, +-0.5}
    # o_ref: (1, 4, tr, Wo)  [LL, HL, LH, HH] along axis 1
    xb = x_ref[0]                              # (tr, 2W)
    xe = xb[:, :w].astype(jnp.float32)         # even rows   (tr, W)
    xo = xb[:, w:].astype(jnp.float32)         # odd rows    (tr, W)
    s = xe + xo                                # row sums  -> LL/HL
    d = xo - xe                                # row diffs -> LH/HH
    m = m_ref[...]
    hc = chunk // 2
    # Column stage: for each pair of columns (2j, 2j+1) produce
    # (sum)/2 and (odd - even)/2, compacted to Wo lanes, via the idle MXU.
    # Products are exact (matrix entries are +-0.5) and only two terms are
    # accumulated per output, so this matches the reference to ~1 ulp.
    for ci in range(w // chunk):
        c0 = ci * chunk
        sm = jnp.dot(s[:, c0:c0 + chunk], m, preferred_element_type=jnp.float32)
        dm = jnp.dot(d[:, c0:c0 + chunk], m, preferred_element_type=jnp.float32)
        lo = ci * hc
        o_ref[0, 0, :, lo:lo + hc] = sm[:, :hc].astype(o_ref.dtype)   # LL
        o_ref[0, 1, :, lo:lo + hc] = sm[:, hc:].astype(o_ref.dtype)   # HL
        o_ref[0, 2, :, lo:lo + hc] = dm[:, :hc].astype(o_ref.dtype)   # LH
        o_ref[0, 3, :, lo:lo + hc] = dm[:, hc:].astype(o_ref.dtype)   # HH


def _pick_tile(n, unit, cap):
    """Largest divisor of n that is <= cap, preferring multiples of `unit`."""
    cap = max(1, min(cap, n))
    if n <= cap:
        return n
    t = (cap // unit) * unit
    while t >= unit:
        if n % t == 0:
            return t
        t -= unit
    for t in range(cap, 0, -1):
        if n % t == 0:
            return t
    return n


@jax.jit
def dwt_haar(x):
    N, C, H, W = x.shape
    assert H % 2 == 0 and W % 2 == 0, "DWT_Haar requires even spatial dims"
    Ho, Wo = H // 2, W // 2
    R = C * Ho  # fold channels and output rows into one "row" axis

    # Free reshape: row r = (c, i) of x2d is [x[n,c,2i,:] | x[n,c,2i+1,:]].
    # Every HBM read issued by the kernel is a dense contiguous block of x.
    x2d = x.reshape(N, R, 2 * W)

    # Column-stage pairing matrix, chunked so MXU flops per element are
    # bounded (<= 2*256) regardless of W.
    if W % 256 == 0:
        chunk = 256
    elif W % 128 == 0:
        chunk = 128
    else:
        chunk = W
    hc = chunk // 2
    m_np = np.zeros((chunk, chunk), np.float32)
    j = np.arange(hc)
    m_np[2 * j, j] = 0.5        # (even + odd)/2
    m_np[2 * j + 1, j] = 0.5
    m_np[2 * j, hc + j] = -0.5  # (odd - even)/2
    m_np[2 * j + 1, hc + j] = 0.5
    m = jnp.asarray(m_np)

    # Row-tile selection: dtype-aware sublane unit; ~12 MiB double-buffered
    # in+out block budget fits the scoped/physical VMEM of v5e, v6e and v7x.
    isz = jnp.dtype(x.dtype).itemsize
    unit = {4: 8, 2: 16, 1: 32}.get(isz, 8)
    budget = 12 * 1024 * 1024
    per_row = 2 * (2 * W * isz + 2 * W * isz)   # double-buffered in + out
    tr = _pick_tile(R, unit, max(unit, budget // per_row))
    # Make sure there are enough grid steps for both TensorCores (v7x).
    while N * (R // tr) < 4 and tr % (2 * unit) == 0:
        tr //= 2

    grid = (N, R // tr)
    kernel = functools.partial(_dwt_haar_kernel, w=W, chunk=chunk)

    out = pl.pallas_call(
        kernel,
        out_shape=jax.ShapeDtypeStruct((N, 4, R, Wo), x.dtype),
        grid=grid,
        in_specs=[
            pl.BlockSpec((1, tr, 2 * W), lambda n, r: (n, r, 0)),
            pl.BlockSpec((chunk, chunk), lambda n, r: (0, 0)),
        ],
        out_specs=pl.BlockSpec((1, 4, tr, Wo), lambda n, r: (n, 0, r, 0)),
        compiler_params=pltpu.CompilerParams(
            dimension_semantics=("parallel", "parallel"),
            vmem_limit_bytes=32 * 1024 * 1024,
        ),
    )(x2d, m)

    # (N, 4, C*Ho, Wo) row-major == (N, 4*C, Ho, Wo) with channel blocks
    # ordered [LL | HL | LH | HH] == torch.cat((LL, HL, LH, HH), dim=1).
    return out.reshape(N, 4 * C, Ho, Wo)


def dwt_haar_ref(x):
    # Pure-JAX reference mirroring the PyTorch _dwt_haar exactly.
    x01 = x[:, :, 0::2, :] / 2
    x02 = x[:, :, 1::2, :] / 2
    x1 = x01[:, :, :, 0::2]
    x2 = x02[:, :, :, 0::2]
    x3 = x01[:, :, :, 1::2]
    x4 = x02[:, :, :, 1::2]
    LL = x1 + x2 + x3 + x4
    HL = -x1 - x2 + x3 + x4
    LH = -x1 + x2 - x3 + x4
    HH = x1 - x2 - x3 + x4
    return jnp.concatenate((LL, HL, LH, HH), axis=1)


if __name__ == "__main__":
    key = jax.random.PRNGKey(0)
    x = jax.random.normal(key, (2, 4, 16, 16), dtype=jnp.float32)

    out = jax.block_until_ready(dwt_haar(x))
    ref = dwt_haar_ref(x)

    assert out.shape == (2, 16, 8, 8), out.shape
    assert out.dtype == x.dtype
    err = float(jnp.max(jnp.abs(out - ref)))
    assert jnp.allclose(out, ref, atol=1e-5, rtol=1e-5), err

    print("KERNEL_OK")
</pallas_src>

<mosaic_0001>
module attributes {stable_mosaic.version = 11 : i64} {
  func.func @_dwt_haar_kernel(%arg0: i32, %arg1: i32, %arg2: memref<1x16x32xf32, #tpu.memory_space<vmem>>, %arg3: memref<16x16xf32, #tpu.memory_space<vmem>>, %arg4: memref<1x4x16x8xf32, #tpu.memory_space<vmem>>) attributes {dimension_semantics = [#tpu.dimension_semantics<parallel>, #tpu.dimension_semantics<parallel>], iteration_bounds = array<i64: 2, 2>, scalar_prefetch = 0 : i64, scratch_operands = 0 : i64, tpu.core_type = #tpu.core_type<tc>, window_params = [{transform_indices = @transform_0, window_bounds = array<i64: 1, 16, 32>}, {pipeline_mode = #tpu.pipeline_mode<synchronous>, transform_indices = @transform_1, window_bounds = array<i64: 16, 16>}, {transform_indices = @transform_2, window_bounds = array<i64: 1, 4, 16, 8>}]} {
    %c0 = arith.constant 0 : index
    %c0_0 = arith.constant 0 : index
    %c0_1 = arith.constant 0 : index
    %0 = vector.load %arg2[%c0, %c0_0, %c0_1] : memref<1x16x32xf32, #tpu.memory_space<vmem>>, vector<1x16x32xf32>
    %1 = vector.shape_cast %0 : vector<1x16x32xf32> to vector<16x32xf32>
    %2 = vector.extract_strided_slice %1 {offsets = [0, 0], sizes = [16, 16], strides = [1, 1]} : vector<16x32xf32> to vector<16x16xf32>
    %3 = vector.extract_strided_slice %1 {offsets = [0, 16], sizes = [16, 16], strides = [1, 1]} : vector<16x32xf32> to vector<16x16xf32>
    %4 = arith.addf %2, %3 : vector<16x16xf32>
    %5 = arith.subf %3, %2 : vector<16x16xf32>
    %c0_2 = arith.constant 0 : index
    %c0_3 = arith.constant 0 : index
    %6 = vector.load %arg3[%c0_2, %c0_3] : memref<16x16xf32, #tpu.memory_space<vmem>>, vector<16x16xf32>
    %cst = arith.constant dense<0.000000e+00> : vector<16x16xf32>
    %7 = tpu.matmul %4, %6, %cst {dimension_numbers = #tpu.dot_dimension_numbers<[1], [0], [0], [1], [0, 0, 1, 1], [], []>} : vector<16x16xf32>, vector<16x16xf32>, vector<16x16xf32> -> vector<16x16xf32>
    %cst_4 = arith.constant dense<0.000000e+00> : vector<16x16xf32>
    %8 = tpu.matmul %5, %6, %cst_4 {dimension_numbers = #tpu.dot_dimension_numbers<[1], [0], [0], [1], [0, 0, 1, 1], [], []>} : vector<16x16xf32>, vector<16x16xf32>, vector<16x16xf32> -> vector<16x16xf32>
    %9 = vector.extract_strided_slice %7 {offsets = [0, 0], sizes = [16, 8], strides = [1, 1]} : vector<16x16xf32> to vector<16x8xf32>
    %c0_5 = arith.constant 0 : index
    %c0_6 = arith.constant 0 : index
    %c0_7 = arith.constant 0 : index
    %c0_8 = arith.constant 0 : index
    %10 = vector.load %arg4[%c0_5, %c0_6, %c0_7, %c0_8] : memref<1x4x16x8xf32, #tpu.memory_space<vmem>>, vector<1x1x16x8xf32>
    %11 = vector.shape_cast %10 : vector<1x1x16x8xf32> to vector<16x8xf32>
    %12 = vector.shape_cast %9 : vector<16x8xf32> to vector<1x1x16x8xf32>
    tpu.vector_store %arg4[%c0_5, %c0_6, %c0_7, %c0_8], %12 {strides = array<i32>} : memref<1x4x16x8xf32, #tpu.memory_space<vmem>>, vector<1x1x16x8xf32>,
    %13 = vector.extract_strided_slice %7 {offsets = [0, 8], sizes = [16, 8], strides = [1, 1]} : vector<16x16xf32> to vector<16x8xf32>
    %c0_9 = arith.constant 0 : index
    %c1 = arith.constant 1 : index
    %c0_10 = arith.constant 0 : index
    %c0_11 = arith.constant 0 : index
    %14 = vector.load %arg4[%c0_9, %c1, %c0_10, %c0_11] : memref<1x4x16x8xf32, #tpu.memory_space<vmem>>, vector<1x1x16x8xf32>
    %15 = vector.shape_cast %14 : vector<1x1x16x8xf32> to vector<16x8xf32>
    %16 = vector.shape_cast %13 : vector<16x8xf32> to vector<1x1x16x8xf32>
    tpu.vector_store %arg4[%c0_9, %c1, %c0_10, %c0_11], %16 {strides = array<i32>} : memref<1x4x16x8xf32, #tpu.memory_space<vmem>>, vector<1x1x16x8xf32>,
    %17 = vector.extract_strided_slice %8 {offsets = [0, 0], sizes = [16, 8], strides = [1, 1]} : vector<16x16xf32> to vector<16x8xf32>
    %c0_12 = arith.constant 0 : index
    %c2 = arith.constant 2 : index
    %c0_13 = arith.constant 0 : index
    %c0_14 = arith.constant 0 : index
    %18 = vector.load %arg4[%c0_12, %c2, %c0_13, %c0_14] : memref<1x4x16x8xf32, #tpu.memory_space<vmem>>, vector<1x1x16x8xf32>
    %19 = vector.shape_cast %18 : vector<1x1x16x8xf32> to vector<16x8xf32>
    %20 = vector.shape_cast %17 : vector<16x8xf32> to vector<1x1x16x8xf32>
    tpu.vector_store %arg4[%c0_12, %c2, %c0_13, %c0_14], %20 {strides = array<i32>} : memref<1x4x16x8xf32, #tpu.memory_space<vmem>>, vector<1x1x16x8xf32>,
    %21 = vector.extract_strided_slice %8 {offsets = [0, 8], sizes = [16, 8], strides = [1, 1]} : vector<16x16xf32> to vector<16x8xf32>
    %c0_15 = arith.constant 0 : index
    %c3 = arith.constant 3 : index
    %c0_16 = arith.constant 0 : index
    %c0_17 = arith.constant 0 : index
    %22 = vector.load %arg4[%c0_15, %c3, %c0_16, %c0_17] : memref<1x4x16x8xf32, #tpu.memory_space<vmem>>, vector<1x1x16x8xf32>
    %23 = vector.shape_cast %22 : vector<1x1x16x8xf32> to vector<16x8xf32>
    %24 = vector.shape_cast %21 : vector<16x8xf32> to vector<1x1x16x8xf32>
    tpu.vector_store %arg4[%c0_15, %c3, %c0_16, %c0_17], %24 {strides = array<i32>} : memref<1x4x16x8xf32, #tpu.memory_space<vmem>>, vector<1x1x16x8xf32>,
    return
  }
  func.func @transform_0(%arg0: i32, %arg1: i32) -> (i32, i32, i32) {
    %c0_i32 = arith.constant 0 : i32
    %c0_i32_0 = arith.constant 0 : i32
    return %arg0, %arg1, %c0_i32 : i32, i32, i32
  }
  func.func @transform_1(%arg0: i32, %arg1: i32) -> (i32, i32) {
    %c0_i32 = arith.constant 0 : i32
    %c0_i32_0 = arith.constant 0 : i32
    %c0_i32_1 = arith.constant 0 : i32
    return %c0_i32, %c0_i32_0 : i32, i32
  }
  func.func @transform_2(%arg0: i32, %arg1: i32) -> (i32, i32, i32, i32) {
    %c0_i32 = arith.constant 0 : i32
    %c0_i32_0 = arith.constant 0 : i32
    %c0_i32_1 = arith.constant 0 : i32
    return %arg0, %c0_i32, %arg1, %c0_i32_0 : i32, i32, i32, i32
  }
}

</mosaic_0001>

<bundles_post_ra>
// kernel: dwt_haar.1
= control target key start
LH: loop header
LB: loop body
LE: loop exit
PB: predicated region body
PF: predicated region fallthrough
CT: control target
= control target key end

     0   :  { %s710_s9 = smov 0   ;;  %s712_s10 = smov 0   ;;  %s837_s0 = inlined_call_operand.vmem [shape: f32[2,32,32], index: 0, kind: input, shape index: {}]   ;;  %s838_s1 = inlined_call_operand.vmem [shape: f32[16,16], index: 1, kind: input, shape index: {}]   ;;  %s839_s2 = inlined_call_operand.vmem [shape: f32[2,4,32,8], index: 2, kind: output, shape index: {}]  }
   0x1   :  { %s714_s11 = smov 0   ;;  %s716_s12 = smov 0  }
   0x2   :  { %s718_s13 = smov 0   ;;  %s720_s14 = smov 0  }
   0x3   :  { %s722_s15 = smov 0  }
   0x4 LB: > { %s21_s16 = sadd.s32 1, %s682_s13  ;;  %s24_s17 = sadd.s32 1, %s686_s14  ;;  %s690_s15 = sphi %s722_s15, %s12_s15   ;;  %s686_s14 = sphi %s720_s14, %s846_s14   ;;  %s682_s13 = sphi %s718_s13, %s845_s13   ;;  %s678_s12 = sphi %s716_s12, %s844_s12   ;;  %s674_s11 = sphi %s714_s11, %s843_s11   ;;  %s670_s10 = sphi %s712_s10, %s842_s10   ;;  %s666_s9 = sphi %s710_s9, %s841_s9  }
   0x5   : > { %p22_p0 = scmp.ge.s32.totalorder %s21_s16, 2  ;;  %s530_s18 = sadd.s32 4294967295, %s690_s15  }
   0x6   : > { %p92_p1 = scmp.ne.s32.totalorder %s670_s10, %s666_s9  ;;  %p93_p2 = scmp.eq.s32.totalorder %s530_s18, 3 }
   0x7   : > { %s848_s16 = smov (%p22_p0, %s21_s16), 0  ;;  %s850_s17 = smov (!%p22_p0, %s24_s17), %s686_s14 }
   0x8   : > { %s78_s19 = ssub.s32 %s682_s13, %s848_s16  ;;  %p26_p3 = scmp.ge.s32.totalorder %s850_s17, 2 }
   0x9   : > { %p534_p4 = scmp.ge.s32.totalorder %s690_s15, 1  ;;  %p754_p5 = por %p93_p2, %p92_p1 }
   0xa   : > { %p133_p6 = scmp.lt.s32.totalorder %s690_s15, 5  ;;  %s852_s17 = smov (%p26_p3, %s850_s17), 0 }
   0xb   : > { %s77_s21 = ssub.s32 %s686_s14, %s852_s17  ;;  %s82_s23 = sadd.s32 1, %s670_s10 }
   0xc   : > { %p134_p7 = pnand %p534_p4, %p133_p6  ;;  %s79_s22 = sor.u32 %s78_s19, %s77_s21 }
   0xd   : > { %p80_p8 = scmp.eq.s32.totalorder %s79_s22, 0  ;;  %s767_s25 = sshll.u32 (!%p134_p7), %s674_s11, 1 }
   0xe   : > { %137 = sbr.rel (%p134_p7) target bundleno = 581 (0x245), region = 28  ;;  %p159_p9 = scmp.lt.s32.totalorder (!%p134_p7), %s678_s12, 1 }
   0xf   : > { %s765_s24 = scalar_select %p80_p8, %s670_s10, %s82_s23  }
  0x10   : > { %p161_p10 = scmp.lt.s32.totalorder (!%p134_p7), %s767_s25, 3  ;;  %s692_s18 = smov (!%p134_p7), 16  }
  0x11   : > { %s693_s19 = smov (!%p134_p7), 112   ;;  %s155_s21 = sand.u32 (!%p134_p7), 1, %s666_s9  }
  0x12   : > { %s535_s22 = sshll.u32 (!%p134_p7), %s155_s21, 6 }
  0x13   : > { %s160_s26 = scalar_select %p159_p9, %s678_s12, 1  ;;  %v190_v0 = vld [vmem:[%s838_s1 + $0x8] sm:$0xff]  ;;  %v189_v1 = vld [vmem:[%s838_s1] sm:$0xff]  ;;  %vm191_vm0 = vcmask 130048   ;;  %vm358_vm1 = vcmask 64512  }
  0x14   : > { %s162_s3 = scalar_select %p161_p10, %s767_s25, 3  ;;  %563 = vmatprep.subr.mxu0 %v190_v0  ;;  %570 = vmatprep.subr.mxu1 %v190_v0 }
  0x15   : > { %s537_s4 = sshll.u32 %s160_s26, 2  ;;  %564 = vmatpush3.msra.mxu0 %v190_v0  ;;  %571 = vmatpush3.msra.mxu1 %v190_v0  ;;  %s783_s23 = scalar_lea.vmem [#allocation2], %s535_s22 }
  0x16   : > { %s164_s5 = sadd.s32 %s537_s4, %s162_s3  ;;  %565 = vmatprep.subr.mxu0 %v189_v1  ;;  %572 = vmatprep.subr.mxu1 %v189_v1  ;;  %s694_s26 = smov 120  }
  0x17   : > { %s538_s6 = sshll.u32 %s164_s5, 3  ;;  %566 = vmatpush3.msra.mxu0 %v189_v1  ;;  %573 = vmatpush3.msra.mxu1 %v189_v1  ;;  %s551_s9 = sshll.u32 (%p754_p5), %s678_s12, 4 }
  0x18   : > { %s166_s11 = scalar_lea.vmem %s837_s0, %s538_s6  ;;  %s395_s27 = sadd.s32 (%p754_p5), %s551_s9, %s767_s25 }
  0x19   : > { %v169_v2 = vld [vmem:[%s166_s11] sm:$0xff]  ;;  %v170_v3 = vld [vmem:[%s166_s11 + $0x8] sm:$0xff]  ;;  %s552_s20 = sshll.u32 (%p754_p5), %s395_s27, 3 }
  0x1a   : > { %181 = vrot.lane.b32.xlu0 %v169_v2, %s692_s18  ;;  %173 = vrot.lane.b32.xlu1 %v169_v2, %s693_s19  ;;  %s397_s30 = scalar_lea.vmem (%p754_p5), %s839_s2, %s552_s20 }
  0x1e   : > { %183 = vrot.lane.b32.xlu0 %v170_v3, %s692_s18  ;;  %175 = vrot.lane.b32.xlu1 %v170_v3, %s693_s19 }
  0x8c   : > { %v182_v4 = vpop.permute.xlu0 %181  ;;  %v174_v5 = vpop.permute.xlu1 %173 }
  0x8d   : > { %v187_v6 = vsub.f32 %v169_v2, %v182_v4  ;;  %v179_v7 = vadd.f32 %v174_v5, %v169_v2 }
  0x8f   : > { %275 = vrot.lane.b32.xlu0 %v187_v6, %s693_s19  ;;  %567 = vmatprep.mubr.msk.f32.mxu0 %vm191_vm0, %v179_v7 }
  0x90   : > { %v184_v8 = vpop.permute.xlu0 %183  ;;  %v176_v9 = vpop.permute.xlu1 %175 }
  0x91   : > { %v188_v10 = vsub.f32 %v170_v3, %v184_v8  ;;  %v180_v11 = vadd.f32 %v176_v9, %v170_v3 }
  0x93   : > { %277 = vrot.lane.b32.xlu1 %v188_v10, %s693_s19  ;;  %568 = vmatmul.mubr.msk.f32.vlgmr.msra.gmra.mxu0 %vm191_vm0, %v180_v11 }
 0x101   : > { %v276_v12 = vpop.permute.xlu0 %275 }
 0x102   : > { %574 = vmatprep.mubr.msk.f32.mxu1 %vm191_vm0, %v276_v12 }
 0x105   : > { %v278_v13 = vpop.permute.xlu1 %277 }
 0x106   : > { %575 = vmatmul.mubr.msk.f32.vlgmr.msra.gmra.mxu1 %vm191_vm0, %v278_v13 }
 0x153   : > { %v569_v14 = vpop.f32.mrf.mxu0 }
 0x154   : > { %360 = vst.msk [vmem:[%s783_s23 + $0x8] sm:$0xff] %vm358_vm1, %v569_v14  ;;  %365 = vrot.lane.b32.xlu1 %v569_v14, %s694_s26 }
 0x155   : > { %v264_v15 = vpop.f32.mrf.mxu0 }
 0x156   : > { %359 = vst.msk [vmem:[%s783_s23] sm:$0xff] %vm358_vm1, %v264_v15  ;;  %363 = vrot.lane.b32.xlu0 %v264_v15, %s694_s26 }
 0x15b   : > { %v442_v23 = vld [vmem:[%s783_s23 + $0x8] sm:$0xff] (%p754_p5) }
 0x15c   : > { %443 = vst [vmem:[%s397_s30 + $0x8] sm:$0xff] (%p754_p5), %v442_v23 }
 0x15d   : > { %v440_v22 = vld [vmem:[%s783_s23] sm:$0xff] (%p754_p5) }
 0x15e   : > { %441 = vst [vmem:[%s397_s30] sm:$0xff] (%p754_p5), %v440_v22 }
 0x1c6   : > { %v576_v16 = vpop.f32.mrf.mxu1  ;;  %v366_v17 = vpop.permute.xlu1 %365 }
 0x1c7   : > { %546 = vst.msk [vmem:[%s783_s23 + $0x28] sm:$0xff] %vm358_vm1, %v576_v16  ;;  %379 = vrot.lane.b32.xlu1 %v576_v16, %s694_s26  ;;  %544 = vst.msk [vmem:[%s783_s23 + $0x18] sm:$0xff] %vm358_vm1, %v366_v17 }
 0x1c8   : > { %v349_v18 = vpop.f32.mrf.mxu1  ;;  %v364_v19 = vpop.permute.xlu0 %363 }
 0x1c9   : > { %545 = vst.msk [vmem:[%s783_s23 + $0x20] sm:$0xff] %vm358_vm1, %v349_v18  ;;  %377 = vrot.lane.b32.xlu0 %v349_v18, %s694_s26  ;;  %543 = vst.msk [vmem:[%s783_s23 + $0x10] sm:$0xff] %vm358_vm1, %v364_v19 }
 0x1ce   : > { %v446_v25 = vld [vmem:[%s783_s23 + $0x18] sm:$0xff] (%p754_p5)  ;;  %v450_v27 = vld [vmem:[%s783_s23 + $0x28] sm:$0xff] (%p754_p5) }
 0x1cf   : > { %447 = vst [vmem:[%s397_s30 + $0x28] sm:$0xff] (%p754_p5), %v446_v25  ;;  %451 = vst [vmem:[%s397_s30 + $0x48] sm:$0xff] (%p754_p5), %v450_v27 }
 0x1d0   : > { %v444_v24 = vld [vmem:[%s783_s23 + $0x10] sm:$0xff] (%p754_p5)  ;;  %v448_v26 = vld [vmem:[%s783_s23 + $0x20] sm:$0xff] (%p754_p5) }
 0x1d1   : > { %445 = vst [vmem:[%s397_s30 + $0x20] sm:$0xff] (%p754_p5), %v444_v24  ;;  %449 = vst [vmem:[%s397_s30 + $0x40] sm:$0xff] (%p754_p5), %v448_v26 }
 0x238   : > { %392 = sbr.rel (!%p754_p5) target bundleno = 581 (0x245), region = 32 }
 0x239   : > { %v380_v20 = vpop.permute.xlu1 %379 }
 0x23a   : > { %548 = vst.msk [vmem:[%s783_s23 + $0x38] sm:$0xff] %vm358_vm1, %v380_v20 }
 0x23b   : > { %v378_v21 = vpop.permute.xlu0 %377 }
 0x23c   : > { %547 = vst.msk [vmem:[%s783_s23 + $0x30] sm:$0xff] %vm358_vm1, %v378_v21 }
 0x241   : > { %v454_v29 = vld [vmem:[%s783_s23 + $0x38] sm:$0xff] }
 0x242   : > { %455 = vst [vmem:[%s397_s30 + $0x68] sm:$0xff] %v454_v29 }
 0x243   : > { %v452_v28 = vld [vmem:[%s783_s23 + $0x30] sm:$0xff] }
 0x244   : > { %453 = vst [vmem:[%s397_s30 + $0x60] sm:$0xff] %v452_v28 }
 0x245 PF: > { %s12_s15 = sadd.s32 1, %s690_s15   ;;  %s841_s9 = smov %s670_s10 }
 0x246   : > { %p9_p11 = scmp.ge.s32.totalorder %s12_s15, 6   ;;  %s842_s10 = smov %s765_s24 }
 0x247   : > { %s843_s11 = smov %s682_s13  ;;  %s844_s12 = smov %s686_s14 }
 0x248   : > { %s845_s13 = smov %s848_s16  ;;  %s846_s14 = smov %s852_s17 }
 0x249   :  { %11 = sbr.rel (!%p9_p11) target bundleno = 4 (0x4), region = 99 }

</bundles_post_ra>
